<compile_context>
chip_gen: v7x
topology: tpu7x:2x2x1
jax: 0.10.0
libtpu: 0.0.40
codegen_flags: <defaults>
</compile_context>

<pallas_src>
import math

import jax
import jax.numpy as jnp
from jax.experimental import pallas as pl
from jax.experimental.pallas import tpu as pltpu

EPS = 1e-07


def _round_up(v: int, m: int) -> int:
    return (v + m - 1) // m * m


def _make_nce_kernel(n_data: int, bsz: int, ncols: int,
                     tile_rows: int, need_mask: bool):
    """Kernel closure with all scalar constants folded at trace time."""
    K = ncols - 1
    k_pn = float(K) / float(n_data)          # K * Pn
    denom_c = k_pn + EPS                     # K*Pn + eps (shared denominator)
    const_term = float(bsz) * float(K) * math.log(k_pn)   # hoisted neg term
    neg_inv_bsz = -1.0 / float(bsz)          # full batch size, not tile size

    def nce_kernel(x_ref, out_ref, acc_ref):
        i = pl.program_id(0)

        @pl.when(i == 0)
        def _init():
            acc_ref[0] = jnp.float32(0.0)

        x = x_ref[...].astype(jnp.float32)                 # [TB, K+1]

        # Single full-size transcendental: shared denominator log.
        denom = jnp.log(x + jnp.float32(denom_c))          # EUP
        row_sum = jnp.sum(denom, axis=1, keepdims=True)    # XLU lane reduce
        pos_log = jnp.log(x[:, 0:1])                       # [TB, 1] only
        per_row = pos_log - row_sum                        # [TB, 1]

        if need_mask:
            # Zero out rows past the real batch (partial last block; any
            # NaN/Inf from padding garbage is discarded by the select).
            row = (jax.lax.broadcasted_iota(jnp.int32, (tile_rows, 1), 0)
                   + i * tile_rows)
            per_row = jnp.where(row < bsz, per_row, jnp.float32(0.0))

        acc_ref[0] += jnp.sum(per_row)

        @pl.when(i == pl.num_programs(0) - 1)
        def _finalize():
            out_ref[0] = ((acc_ref[0] + jnp.float32(const_term))
                          * jnp.float32(neg_inv_bsz))

    return nce_kernel


def nce_criterion(x: jax.Array, n_data: int,
                  target_block_bytes: int = 2 * 1024 * 1024) -> jax.Array:
    """Pallas-backed NCE loss. x: [batch, K+1]. Returns shape [1] float32."""
    bsz, ncols = x.shape

    # Batch tile sized so one f32 block is ~<= 2 MiB (x2 for double buffering
    # still comfortably fits v7x's 32 MiB scoped VMEM default), multiple of 8
    # sublanes, clamped to the (8-rounded) batch for tiny inputs.
    rows_for_target = max(8, (target_block_bytes // (ncols * 4)) // 8 * 8)
    tile_rows = int(min(rows_for_target, _round_up(bsz, 8)))
    num_tiles = pl.cdiv(bsz, tile_rows)
    need_mask = (num_tiles * tile_rows != bsz)

    kernel = _make_nce_kernel(n_data, bsz, ncols, tile_rows, need_mask)

    out = pl.pallas_call(
        kernel,
        out_shape=jax.ShapeDtypeStruct((1,), jnp.float32),
        grid=(num_tiles,),
        in_specs=[pl.BlockSpec((tile_rows, ncols), lambda i: (i, 0))],
        out_specs=pl.BlockSpec(memory_space=pltpu.MemorySpace.SMEM),
        scratch_shapes=[pltpu.SMEM((1,), jnp.float32)],
        compiler_params=pltpu.CompilerParams(
            dimension_semantics=("arbitrary",)),
    )(x)
    # TODO(synk): v7x-only 2-TensorCore split of the reduction (per-core
    # partial sums combined in the wrapper) is not implemented; single-core
    # sequential reduction is used on all generations.
    return out  # shape [1], matches torch


def nce_criterion_ref(x: jax.Array, n_data: int) -> jax.Array:
    """Pure-JAX reference mirroring the PyTorch forward."""
    bsz = x.shape[0]
    K = x.shape[1] - 1
    Pn = 1.0 / n_data
    P_pos = x[:, 0]
    P_neg = x[:, 1:]
    log_D1 = jnp.log(P_pos) - jnp.log(P_pos + K * Pn + EPS)
    log_D0 = jnp.log(K * Pn) - jnp.log(P_neg + K * Pn + EPS)
    loss = -(log_D1.sum(0) + log_D0.reshape(-1, 1).sum(0)) / bsz
    return loss  # shape [1]


if __name__ == "__main__":
    key = jax.random.PRNGKey(0)
    batch = 2
    n_neg = 7          # K = 7 -> x has K+1 = 8 columns
    n_data = 128       # dataset size -> Pn = 1/128

    # NCE inputs are (positive) probabilities/scores; keep them > 0 for log.
    x = jax.random.uniform(
        key, (batch, n_neg + 1), dtype=jnp.float32, minval=0.05, maxval=1.0
    )

    loss = nce_criterion(x, n_data)
    loss = jax.block_until_ready(loss)

    ref = nce_criterion_ref(x, n_data)
    assert loss.shape == (1,), loss.shape
    assert jnp.allclose(loss, ref, rtol=1e-4, atol=1e-4), (loss, ref)

    print("KERNEL_OK")
</pallas_src>

<mosaic_0001>
module attributes {stable_mosaic.version = 11 : i64} {
  func.func @nce_kernel(%arg0: i32, %arg1: memref<8x8xf32, #tpu.memory_space<vmem>>, %arg2: memref<1xf32, #tpu.memory_space<smem>>, %arg3: memref<1xf32, #tpu.memory_space<smem>>) attributes {dimension_semantics = [#tpu.dimension_semantics<arbitrary>], iteration_bounds = array<i64: 1>, scalar_prefetch = 0 : i64, scratch_operands = 1 : i64, tpu.core_type = #tpu.core_type<tc>, window_params = [{transform_indices = @transform_0, window_bounds = array<i64: 8, 8>}, {transform_indices = @transform_1, window_bounds = array<i64: 1>}]} {
    %c0_i32 = arith.constant 0 : i32
    %0 = arith.cmpi eq, %arg0, %c0_i32 : i32
    %1 = arith.extui %0 : i1 to i32
    %c0_i32_0 = arith.constant 0 : i32
    %2 = arith.cmpi ne, %1, %c0_i32_0 : i32
    scf.if %2 {
      %cst_9 = arith.constant 0.000000e+00 : f32
      %c0_10 = arith.constant 0 : index
      %30 = memref.load %arg3[%c0_10] : memref<1xf32, #tpu.memory_space<smem>>
      memref.store %cst_9, %arg3[%c0_10] : memref<1xf32, #tpu.memory_space<smem>>
    } else {
    }
    %c0 = arith.constant 0 : index
    %c0_1 = arith.constant 0 : index
    %3 = vector.load %arg1[%c0, %c0_1] : memref<8x8xf32, #tpu.memory_space<vmem>>, vector<8x8xf32>
    %cst = arith.constant 5.468760e-02 : f32
    %4 = vector.broadcast %cst : f32 to vector<8x8xf32>
    %5 = arith.addf %3, %4 : vector<8x8xf32>
    %6 = math.log %5 : vector<8x8xf32>
    %cst_2 = arith.constant dense<0.000000e+00> : vector<8xf32>
    %7 = vector.multi_reduction <add>, %6, %cst_2 [1] : vector<8x8xf32> to vector<8xf32>
    %8 = vector.shape_cast %7 : vector<8xf32> to vector<8x1xf32>
    %9 = vector.extract_strided_slice %3 {offsets = [0, 0], sizes = [8, 1], strides = [1, 1]} : vector<8x8xf32> to vector<8x1xf32>
    %10 = math.log %9 : vector<8x1xf32>
    %11 = arith.subf %10, %8 : vector<8x1xf32>
    %12 = tpu.iota {dimensions = array<i32: 0>} : vector<8x1xi32>
    %c8_i32 = arith.constant 8 : i32
    %13 = arith.muli %arg0, %c8_i32 : i32
    %14 = vector.broadcast %13 : i32 to vector<8x1xi32>
    %15 = arith.addi %12, %14 : vector<8x1xi32>
    %c2_i32 = arith.constant 2 : i32
    %16 = vector.broadcast %c2_i32 : i32 to vector<8x1xi32>
    %17 = arith.cmpi slt, %15, %16 : vector<8x1xi32>
    %cst_3 = arith.constant 0.000000e+00 : f32
    %18 = vector.broadcast %cst_3 : f32 to vector<8x1xf32>
    %19 = arith.select %17, %11, %18 : vector<8x1xi1>, vector<8x1xf32>
    %c0_4 = arith.constant 0 : index
    %20 = memref.load %arg3[%c0_4] : memref<1xf32, #tpu.memory_space<smem>>
    %21 = vector.shape_cast %19 : vector<8x1xf32> to vector<1x8x1xf32>
    %cst_5 = arith.constant dense<0.000000e+00> : vector<1xf32>
    %22 = vector.multi_reduction <add>, %21, %cst_5 [1, 2] : vector<1x8x1xf32> to vector<1xf32>
    %23 = vector.shape_cast %22 : vector<1xf32> to vector<1x1x1xf32>
    %24 = vector.extract %23[0, 0, 0] : f32 from vector<1x1x1xf32>
    %25 = arith.addf %20, %24 : f32
    %c0_6 = arith.constant 0 : index
    %26 = memref.load %arg3[%c0_6] : memref<1xf32, #tpu.memory_space<smem>>
    memref.store %25, %arg3[%c0_6] : memref<1xf32, #tpu.memory_space<smem>>
    %c0_i32_7 = arith.constant 0 : i32
    %27 = arith.cmpi eq, %arg0, %c0_i32_7 : i32
    %28 = arith.extui %27 : i1 to i32
    %c0_i32_8 = arith.constant 0 : i32
    %29 = arith.cmpi ne, %28, %c0_i32_8 : i32
    scf.if %29 {
      %c0_9 = arith.constant 0 : index
      %30 = memref.load %arg3[%c0_9] : memref<1xf32, #tpu.memory_space<smem>>
      %cst_10 = arith.constant -40.6856804 : f32
      %31 = arith.addf %30, %cst_10 : f32
      %cst_11 = arith.constant -5.000000e-01 : f32
      %32 = arith.mulf %31, %cst_11 : f32
      %c0_12 = arith.constant 0 : index
      %33 = memref.load %arg2[%c0_12] : memref<1xf32, #tpu.memory_space<smem>>
      memref.store %32, %arg2[%c0_12] : memref<1xf32, #tpu.memory_space<smem>>
    } else {
    }
    return
  }
  func.func @transform_0(%arg0: i32) -> (i32, i32) {
    %c0_i32 = arith.constant 0 : i32
    %c0_i32_0 = arith.constant 0 : i32
    return %arg0, %c0_i32 : i32, i32
  }
  func.func @transform_1(%arg0: i32) -> i32 {
    %c0_i32 = arith.constant 0 : i32
    %c0_i32_0 = arith.constant 0 : i32
    return %c0_i32 : i32
  }
}

</mosaic_0001>

<bundles_post_ra>
// kernel: tpu_custom_call.1
= control target key start
LH: loop header
LB: loop body
LE: loop exit
PB: predicated region body
PF: predicated region fallthrough
CT: control target
= control target key end

     0   :  { %6 = vsyncpa [#allocation4], 0  ;;  %s168_s0 = inlined_call_operand.hbm [shape: f32[2,8], index: 0, kind: input, shape index: {}]   ;;  %s169_s1 = inlined_call_operand.hbm [shape: f32[1], index: 1, kind: output, shape index: {}]  }
   0x1   :  { %7 = vsyncpa [#allocation5], 0 }
   0x2   :  { %12 = vsyncadd [#allocation4], 96  ;;  %s130_s6 = smov [#allocation3]   ;;  %s94_s10 = scalar_lea.hbm %s168_s0, 32 }
   0x3   :  { %s13_s7 = sshll.u32 %s130_s6, 4  ;;  %p95_p0 = scmp.ne.s32.totalorder %s168_s0, %s94_s10  ;;  %s14_s7 = int_to_ptr.vmem [resolvable:$true] %s13_s7 }
   0x4   :  { %p98_p1 = scmp.lt.u32.totalorder %s94_s10, %s168_s0 }
   0x6   :  { %p100_p2 = pnand %p98_p1, %p95_p0 }
   0x8   :  { %103 = shalt.err (!%p100_p2)
}
   0x9   :  { %s104_s15 = scalar_lea.vmem %s14_s7, 32  ;;  %s108_s16 = scalar_lea.vmem %s14_s7, 128 }
   0xa   :  { %p105_p3 = scmp.ne.s32.totalorder %s14_s7, %s104_s15  ;;  %p109_p4 = scmp.lt.s32.totalorder %s14_s7, %s14_s7 }
   0xb   :  { %p110_p5 = scmp.lt.s32.totalorder %s108_s16, %s104_s15 }
   0xd   :  { %p111_p6 = por %p110_p5, %p109_p4 }
   0xf   :  { %p112_p7 = pnand %p111_p6, %p105_p3 }
  0x11   :  { %115 = shalt.err (!%p112_p7)
}
  0x12   :  { %s131_s17 = smov 32   ;;  %s132_s18 = smov 2  }
  0x13   :  { %19 = dma.hbm_to_vmem [thread:$0]  %s168_s0, 32, %s14_s7, [#allocation4], %s131_s17, %s131_s17, %s132_s18  }
  0x14   :  { %126 = dma.done.wait [#allocation4], 128  }
  0x15   :  { %127 = vsyncadd [#allocation4], 4294967168  ;;  %v29_v0 = vld [vmem:[#allocation3] sm:$0xff]  ;;  %vm33_vm0 = vcmask 64512   ;;  %v40_v5 = vlaneseq  ;;  %vm48_vm2 = vcmask 7168   ;;  %s116_s25 = scalar_lea.hbm %s169_s1, 16 }
  0x16   :  { %v30_v1 = vadd.f32 0.0546876, %v29_v0  ;;  %p117_p8 = scmp.ne.s32.totalorder %s169_s1, %s116_s25  ;;  %p120_p9 = scmp.lt.u32.totalorder %s116_s25, %s169_s1 }
  0x17   :  { %v41_v7 = vshrl.u32 %v40_v5, 7 }
  0x18   :  { %90 = vlog2.f32 %v30_v1  ;;  %p122_p10 = pnand %p120_p9, %p117_p8 }
  0x19   :  { %92 = vlog2.f32 %v29_v0  ;;  %vm45_vm1 = vcmp.lt.s32.totalorder %v41_v7, 2 }
  0x22   :  { %v91_v2 = vpop.eup %90 }
  0x23   :  { %v32_v3 = vmul.f32 0.6931472, %v91_v2  ;;  %v93_v6 = vpop.eup %92 }
  0x24   :  { %v38_v8 = vmul.f32 0.6931472, %v93_v6 }
  0x25   :  { %v34_v4 = vsel %vm33_vm0, %v32_v3, 0.0 }
  0x26   :  { %35 = vadd.xlane.f32.xlu0 %v34_v4 }
  0xb3   :  { %v36_v9 = vpop.xlane.xlu0 %35 }
  0xb4   :  { %v39_v10 = vsub.f32 %v38_v8, %v36_v9 }
  0xb6   :  { %v46_v11 = vsel %vm45_vm1, %v39_v10, 0.0 }
  0xb7   :  { %v49_v12 = vsel %vm48_vm2, %v46_v11, 0.0 }
  0xb8   :  { %50 = vadd.xlane.f32.xlu0 %v49_v12 }
 0x145   :  { %v51_v13 = vpop.xlane.xlu0 %50 }
 0x146   :  { %v52_v14 = vrot.slane %v51_v13, 4 }
 0x148   :  { %v53_v15 = vadd.f32 %v52_v14, %v51_v13 }
 0x14a   :  { %v54_v16 = vrot.slane %v53_v15, 2 }
 0x14c   :  { %v55_v17 = vadd.f32 %v54_v16, %v53_v15 }
 0x14e   :  { %v56_v18 = vrot.slane %v55_v17, 1 }
 0x150   :  { %v57_v19 = vadd.f32 %v56_v18, %v55_v17 }
 0x152   :  { %84 = vpush %v57_v19 }
 0x183   :  { %s85_s0 = spop %84 }
 0x184   :  { %s66_s21 = sadd.f32 -40.68568, %s85_s0 }
 0x186   :  { %s67_s22 = smul.f32 -0.5, %s66_s21 }
 0x188   :  { %69 = sst [smem:[#allocation6]] %s67_s22 }
 0x189   :  { %125 = shalt.err (!%p122_p10)
}
 0x18a   :  { %s133_s30 = smov [#allocation6]  }
 0x18b   :  { %77 = dma.smem_to_hbm %s133_s30, 16, %s169_s1, [#allocation5]  }
 0x18c   :  { %128 = dma.done.wait [#allocation5], 16  }
 0x18d   :  { %129 = vsyncadd [#allocation5], 4294967280 }
 0x18e   :  { %81 = sfence }
 0x18f   :  { %82 = vsyncpa [#allocation4], 1 }
 0x190   :  { %83 = vsyncpa [#allocation5], 1 }

</bundles_post_ra>
